<compile_context>
chip_gen: v6e
topology: v6e:2x2x1
jax: 0.10.0
libtpu: 0.0.40
codegen_flags: <defaults>
</compile_context>

<pallas_src>
from functools import partial

import jax
import jax.numpy as jnp
from jax.experimental import pallas as pl
from jax.experimental.pallas import tpu as pltpu

_COLS = 512  # fixed lane-dense width (multiple of 128)


def _swish_kernel(x_ref, o_ref, *, compute_dtype):
    x = x_ref[...].astype(compute_dtype)
    # sigmoid(x) == 0.5 * tanh(0.5 * x) + 0.5  (one EUP op instead of exp+recip)
    sig = 0.5 * jnp.tanh(0.5 * x) + 0.5
    o_ref[...] = (x * sig).astype(o_ref.dtype)


def _sublane_multiple(dtype):
    itemsize = jnp.dtype(dtype).itemsize
    if itemsize >= 4:
        return 8
    if itemsize == 2:
        return 16
    return 32


def _chip_config():
    """Per-chip block-size / scoped-VMEM targets for this HBM-bound kernel."""
    kind = ""
    try:
        kind = jax.devices()[0].device_kind.lower()
    except Exception:
        pass
    if "v7" in kind or "7x" in kind:
        # v7x: ~3.2 TB/s HBM, 64 MiB VMEM, 2 TensorCores, bf16 VPU/EUP.
        # 4 x 8 MiB live buffers = 32 MiB, limit 44 MiB leaves 12 MiB headroom.
        return dict(block_bytes=8 << 20, vmem_limit=44 << 20,
                    multi_tc=True, bf16_eup=True)
    if "v6" in kind:
        # v6e: ~1.4 TB/s HBM, 128 MiB VMEM, 1 TC, bf16 VPU/EUP.
        # 4 x 4 MiB = 16 MiB live; 48 MiB scoped limit = generous headroom.
        return dict(block_bytes=4 << 20, vmem_limit=48 << 20,
                    multi_tc=False, bf16_eup=True)
    # v5e (and fallback): ~0.8 TB/s HBM. 2 MiB blocks are already ~93% of
    # roofline and 4 x 2 MiB fits the default 16 MiB scoped VMEM, so don't
    # touch the limit. No bf16 VPU/EUP -> always compute in f32 here.
    return dict(block_bytes=2 << 20, vmem_limit=None,
                multi_tc=False, bf16_eup=False)


def swish(x, *, allow_native_bf16=False):
    """Elementwise Swish via Pallas. Accepts any float shape; same shape/dtype out."""
    if not jnp.issubdtype(x.dtype, jnp.floating):
        raise TypeError(f"swish expects a floating dtype, got {x.dtype}")

    orig_shape = x.shape
    dtype = x.dtype
    n = x.size
    if n == 0:
        return x

    cfg = _chip_config()

    # Opt-in bf16-native compute on chips with bf16 VPU/EUP; default keeps f32
    # (matches torch's opmath / the f32 reference bit-for-bit-ish).
    compute_dtype = jnp.float32
    if allow_native_bf16 and dtype == jnp.bfloat16 and cfg["bf16_eup"]:
        compute_dtype = jnp.bfloat16

    flat = x.reshape(-1)
    n_main = (n // _COLS) * _COLS   # cols-aligned prefix handled by the kernel
    tail = n - n_main               # (< _COLS) remainder handled with plain jnp

    pieces = []

    if n_main:
        main = flat if tail == 0 else flat[:n_main]
        rows = n_main // _COLS
        x2 = main.reshape(rows, _COLS)

        itemsize = jnp.dtype(dtype).itemsize
        sub = _sublane_multiple(dtype)

        # Block rows from the per-chip per-buffer budget.
        tr = max(1, cfg["block_bytes"] // (_COLS * itemsize))
        if rows <= sub:
            tr = rows                              # single full-extent block
        else:
            tr = min(tr, rows)
            tr = max(sub, (tr // sub) * sub)       # sublane-packed block rows
            if tr >= rows and cfg["multi_tc"]:
                # Only on multi-TC chips (v7x): split so the "parallel" grid
                # axis has >= 2 programs and both TensorCores get work.
                half = (rows + 1) // 2
                tr = max(sub, ((half + sub - 1) // sub) * sub)

        grid = (pl.cdiv(rows, tr),)

        out2 = pl.pallas_call(
            partial(_swish_kernel, compute_dtype=compute_dtype),
            out_shape=jax.ShapeDtypeStruct((rows, _COLS), dtype),
            grid_spec=pltpu.PrefetchScalarGridSpec(
                num_scalar_prefetch=0,
                grid=grid,
                in_specs=[pl.BlockSpec((tr, _COLS), lambda i: (i, 0))],
                out_specs=pl.BlockSpec((tr, _COLS), lambda i: (i, 0)),
            ),
            compiler_params=pltpu.CompilerParams(
                dimension_semantics=("parallel",),
                vmem_limit_bytes=cfg["vmem_limit"],
            ),
            # NOTE: callers that donate x can pass input_output_aliases={0: 0}
            # to reuse the HBM buffer; omitted here since the demo reuses x.
        )(x2)
        pieces.append(out2.reshape(-1))

    if tail:
        t = flat[n_main:].astype(compute_dtype)
        pieces.append((t * (0.5 * jnp.tanh(0.5 * t) + 0.5)).astype(dtype))

    out_flat = pieces[0] if len(pieces) == 1 else jnp.concatenate(pieces)
    return out_flat.reshape(orig_shape)


if __name__ == "__main__":
    key = jax.random.PRNGKey(0)

    # NCHW, small shapes (2048 elements -> aligned fast path).
    x = jax.random.normal(key, (2, 4, 16, 16), dtype=jnp.float32)
    y = jax.block_until_ready(swish(x))
    ref = x * jax.nn.sigmoid(x)
    assert y.shape == x.shape and y.dtype == x.dtype
    assert jnp.max(jnp.abs(y - ref)) < 1e-5

    # Non-multiple-of-_COLS size exercises the prefix + jnp-tail path.
    x2 = jax.random.normal(jax.random.PRNGKey(1), (2, 300), dtype=jnp.float32)
    y2 = jax.block_until_ready(swish(x2))
    ref2 = x2 * jax.nn.sigmoid(x2)
    assert y2.shape == x2.shape and y2.dtype == x2.dtype
    assert jnp.max(jnp.abs(y2 - ref2)) < 1e-5

    print("KERNEL_OK")
</pallas_src>

<mosaic_0001>
module attributes {stable_mosaic.version = 11 : i64} {
  func.func @_swish_kernel(%arg0: i32, %arg1: memref<4x512xf32, #tpu.memory_space<vmem>>, %arg2: memref<4x512xf32, #tpu.memory_space<vmem>>) attributes {dimension_semantics = [#tpu.dimension_semantics<parallel>], iteration_bounds = array<i64: 1>, scalar_prefetch = 0 : i64, scratch_operands = 0 : i64, tpu.core_type = #tpu.core_type<tc>, window_params = [{transform_indices = @transform_0, window_bounds = array<i64: 4, 512>}, {transform_indices = @transform_1, window_bounds = array<i64: 4, 512>}]} {
    %c0 = arith.constant 0 : index
    %c0_0 = arith.constant 0 : index
    %0 = vector.load %arg1[%c0, %c0_0] : memref<4x512xf32, #tpu.memory_space<vmem>>, vector<4x512xf32>
    %cst = arith.constant 5.000000e-01 : f32
    %1 = vector.broadcast %cst : f32 to vector<4x512xf32>
    %2 = arith.mulf %1, %0 : vector<4x512xf32>
    %3 = math.tanh %2 : vector<4x512xf32>
    %cst_1 = arith.constant 5.000000e-01 : f32
    %4 = vector.broadcast %cst_1 : f32 to vector<4x512xf32>
    %5 = arith.mulf %4, %3 : vector<4x512xf32>
    %cst_2 = arith.constant 5.000000e-01 : f32
    %6 = vector.broadcast %cst_2 : f32 to vector<4x512xf32>
    %7 = arith.addf %5, %6 : vector<4x512xf32>
    %8 = arith.mulf %0, %7 : vector<4x512xf32>
    %c0_3 = arith.constant 0 : index
    %c0_4 = arith.constant 0 : index
    %9 = vector.load %arg2[%c0_3, %c0_4] : memref<4x512xf32, #tpu.memory_space<vmem>>, vector<4x512xf32>
    tpu.vector_store %arg2[%c0_3, %c0_4], %8 {strides = array<i32>} : memref<4x512xf32, #tpu.memory_space<vmem>>, vector<4x512xf32>,
    return
  }
  func.func @transform_0(%arg0: i32) -> (i32, i32) {
    %c0_i32 = arith.constant 0 : i32
    %c0_i32_0 = arith.constant 0 : i32
    return %arg0, %c0_i32 : i32, i32
  }
  func.func @transform_1(%arg0: i32) -> (i32, i32) {
    %c0_i32 = arith.constant 0 : i32
    %c0_i32_0 = arith.constant 0 : i32
    return %arg0, %c0_i32 : i32, i32
  }
}

</mosaic_0001>

<bundles_post_ra>
// kernel: tpu_custom_call.1
= control target key start
LH: loop header
LB: loop body
LE: loop exit
PB: predicated region body
PF: predicated region fallthrough
CT: control target
= control target key end

     0   :  { %6 = vsyncpa [#allocation3], 0  ;;  %s118_s0 = inlined_call_operand.hbm [shape: f32[4,512], index: 0, kind: input, shape index: {}]   ;;  %s119_s1 = inlined_call_operand.hbm [shape: f32[4,512], index: 1, kind: output, shape index: {}]  }
   0x1   :  { %7 = vsyncpa [#allocation4], 0  ;;  %s100_s6 = smov [#allocation2]  }
   0x2   :  { %s14_s7 = sshll.u32 %s100_s6, 4  ;;  %s15_s7 = int_to_ptr.vmem [resolvable:$true] %s14_s7 }
   0x3   :  { %s64_s8 = scalar_lea.vmem %s15_s7, 256  ;;  %p69_p1 = scmp.lt.s32.totalorder %s15_s7, %s15_s7 }
   0x4   :  { %p65_p0 = scmp.ne.s32.totalorder %s15_s7, %s64_s8  ;;  %p70_p2 = scmp.lt.s32.totalorder %s64_s8, %s64_s8 }
   0x6   :  { %p71_p3 = por %p70_p2, %p69_p1 }
   0x8   :  { %p72_p4 = pnand %p71_p3, %p65_p0 }
   0xa   :  { %75 = shalt.err (!%p72_p4)
}
   0xb   :  { %17 = dma.hbm_to_vmem [thread:$0]  %s118_s0, 256, %s15_s7, [#allocation3]  }
   0xc   :  { %96 = dma.done.wait [#allocation3], 256  }
   0xd   :  { %97 = vsyncadd [#allocation3], 4294967040  ;;  %v21_v0 = vld [vmem:[#allocation2] sm:$0xff]  ;;  %v22_v1 = vld [vmem:[#allocation2 + $0x8] sm:$0xff]  ;;  %s101_s11 = smov [#allocation5]  }
   0xe   :  { %v23_v2 = vmul.f32 0.5, %v21_v0  ;;  %v24_v3 = vmul.f32 0.5, %v22_v1  ;;  %s41_s12 = sshll.u32 %s101_s11, 4  ;;  %s42_s12 = int_to_ptr.vmem [resolvable:$true] %s41_s12 }
   0xf   :  { %s76_s0 = scalar_lea.vmem %s42_s12, 256  ;;  %p81_p6 = scmp.lt.s32.totalorder %s42_s12, %s42_s12 }
  0x10   :  { %52 = vtanh.f32 %v23_v2  ;;  %p77_p5 = scmp.ne.s32.totalorder %s42_s12, %s76_s0  ;;  %p82_p7 = scmp.lt.s32.totalorder %s76_s0, %s76_s0 }
  0x11   :  { %54 = vtanh.f32 %v24_v3 }
  0x12   :  { %p83_p8 = por %p82_p7, %p81_p6 }
  0x14   :  { %p84_p9 = pnand %p83_p8, %p77_p5 }
  0x1d   :  { %v53_v4 = vpop.eup %52 }
  0x1e   :  { %v55_v5 = vpop.eup %54  ;;  %v27_v6 = vmul.f32 0.5, %v53_v4 }
  0x1f   :  { %v28_v7 = vmul.f32 0.5, %v55_v5 }
  0x20   :  { %v29_v8 = vadd.f32 0.5, %v27_v6 }
  0x21   :  { %v30_v9 = vadd.f32 0.5, %v28_v7 }
  0x22   :  { %v31_v10 = vmul.f32 %v29_v8, %v21_v0 }
  0x23   :  { %v32_v11 = vmul.f32 %v30_v9, %v22_v1 }
  0x24   :  { %33 = vst [vmem:[#allocation5] sm:$0xff] %v31_v10 }
  0x25   :  { %34 = vst [vmem:[#allocation5 + $0x8] sm:$0xff] %v32_v11 }
  0x26   :  { %87 = shalt.err (!%p84_p9)
}
  0x27   :  { %44 = dma.vmem_to_hbm [thread:$0]  %s42_s12, 256, %s119_s1, [#allocation4]  }
  0x28   :  { %98 = dma.done.wait [#allocation4], 256  }
  0x29   :  { %99 = vsyncadd [#allocation4], 4294967040 }
  0x2a   :  { %48 = vsyncpa [#allocation3], 1 }
  0x2b   :  { %49 = vsyncpa [#allocation4], 1 }

</bundles_post_ra>
